<compile_context>
chip_gen: v7x
topology: tpu7x:2x2x1
jax: 0.10.0
libtpu: 0.0.40
codegen_flags: <defaults>
</compile_context>

<pallas_src>
import jax
import jax.numpy as jnp
from jax import lax
from jax.experimental import pallas as pl
from jax.experimental.pallas import tpu as pltpu


def slow_prior_kernel(codes_ref, cb_ref, cbsq_ref, w1_ref, b1_ref,
                      w2_ref, b2_ref, out_ref, prev_ref):
    x = codes_ref[...]                    # (TB, Dp) f32
    cb = cb_ref[...]                      # (Np, Dp) f32

    # ---- nearest-neighbour "previous code" selection (f32, exact) ----
    # squared distance = ||x||^2 - 2 x.cb + ||cb||^2 ; ||x||^2 constant per row.
    cross = lax.dot_general(x, cb,
                            dimension_numbers=(((1,), (1,)), ((), ())),
                            preferred_element_type=jnp.float32)     # (TB, Np)
    dist = cbsq_ref[...] - 2.0 * cross                              # (TB, Np)
    idx = jnp.argmin(dist, axis=1)                                  # (TB,)
    onehot = (lax.broadcasted_iota(jnp.int32, dist.shape, 1)
              == idx[:, None]).astype(jnp.float32)                  # (TB, Np)
    prev = jnp.dot(onehot, cb, preferred_element_type=jnp.float32)  # (TB, Dp)
    prev_ref[...] = prev

    # ---- encode: fc1 -> ReLU -> fused (fc2_u | fc2_s), bf16 on the MXU ----
    h1 = jnp.dot(prev.astype(jnp.bfloat16), w1_ref[...],
                 preferred_element_type=jnp.float32) + b1_ref[...]  # (TB, H)
    h1 = jnp.maximum(h1, 0.0)
    out_ref[...] = (jnp.dot(h1.astype(jnp.bfloat16), w2_ref[...],
                            preferred_element_type=jnp.float32)
                    + b2_ref[...])                                  # (TB, 2*Dp)


def _round_up(x, m):
    return ((x + m - 1) // m) * m


def slow_prior_forward(codes, codebook, params):
    """codes: (B, code_len) f32; codebook: (N, code_len) f32.
    params: PyTorch-convention weights: w1 (H,D), b1 (H,), w2u/w2s (D,H)->... """
    B, D = codes.shape
    N, _ = codebook.shape
    H = params["w1"].shape[0]

    f32, bf16 = jnp.float32, jnp.bfloat16
    Dp = _round_up(D, 128)                 # lane-dense last dims
    Np = _round_up(N, 128)
    TILE_B = min(128, _round_up(B, 8))     # sublane-aligned batch tile
    Bp = _round_up(B, TILE_B)
    nb = Bp // TILE_B

    # ---- pad / pack constant operands (codebook-constant work hoisted) ----
    codes_p = jnp.zeros((Bp, Dp), f32).at[:B, :D].set(codes.astype(f32))
    cb_p = jnp.zeros((Np, Dp), f32).at[:N, :D].set(codebook.astype(f32))
    cb_sq = jnp.full((1, Np), 1e30, f32).at[0, :N].set(
        jnp.sum(codebook.astype(f32) ** 2, axis=1))

    w1_p = jnp.zeros((Dp, H), bf16).at[:D, :].set(params["w1"].T.astype(bf16))
    b1_p = params["b1"].astype(f32)[None, :]                        # (1, H)

    # fused head: mu in cols [0:D], logstd in cols [Dp:Dp+D]
    w2_p = jnp.zeros((H, 2 * Dp), bf16)
    w2_p = w2_p.at[:, :D].set(params["w2u"].T.astype(bf16))
    w2_p = w2_p.at[:, Dp:Dp + D].set(params["w2s"].T.astype(bf16))
    b2_p = jnp.zeros((1, 2 * Dp), f32)
    b2_p = b2_p.at[0, :D].set(params["b2u"].astype(f32))
    b2_p = b2_p.at[0, Dp:Dp + D].set(params["b2s"].astype(f32))

    flops = 2 * Bp * (2 * Np * Dp + Dp * H + 2 * H * Dp)
    bytes_accessed = (codes_p.size * 4 + cb_p.size * 4 + cb_sq.size * 4
                      + w1_p.size * 2 + b1_p.size * 4
                      + w2_p.size * 2 + b2_p.size * 4
                      + Bp * 2 * Dp * 4 + Bp * Dp * 4)

    out_p, prev_p = pl.pallas_call(
        slow_prior_kernel,
        out_shape=(jax.ShapeDtypeStruct((Bp, 2 * Dp), f32),   # fused mu|logstd
                   jax.ShapeDtypeStruct((Bp, Dp), f32)),      # picked prev codes
        grid=(nb,),
        in_specs=[
            pl.BlockSpec((TILE_B, Dp), lambda i: (i, 0)),     # codes tile
            pl.BlockSpec((Np, Dp), lambda i: (0, 0)),         # codebook (resident)
            pl.BlockSpec((1, Np), lambda i: (0, 0)),          # ||cb||^2
            pl.BlockSpec((Dp, H), lambda i: (0, 0)),          # w1 (bf16)
            pl.BlockSpec((1, H), lambda i: (0, 0)),           # b1
            pl.BlockSpec((H, 2 * Dp), lambda i: (0, 0)),      # fused w2 (bf16)
            pl.BlockSpec((1, 2 * Dp), lambda i: (0, 0)),      # fused b2
        ],
        out_specs=(pl.BlockSpec((TILE_B, 2 * Dp), lambda i: (i, 0)),
                   pl.BlockSpec((TILE_B, Dp), lambda i: (i, 0))),
        compiler_params=pltpu.CompilerParams(
            dimension_semantics=("parallel",)),
        cost_estimate=pl.CostEstimate(flops=int(flops), transcendentals=0,
                                      bytes_accessed=int(bytes_accessed)),
    )(codes_p, cb_p, cb_sq, w1_p, b1_p, w2_p, b2_p)

    mu = out_p[:B, :D]
    logstd = out_p[:B, Dp:Dp + D]
    prev = prev_p[:B, :D]
    return mu, logstd, prev


def init_params(key, code_len, hidden=512):
    """Deterministic init with PyTorch Linear shapes: W (out,in), b (out,)."""
    ks = jax.random.split(key, 6)

    def linear(kw, kb, fan_in, fan_out):
        bound = 1.0 / jnp.sqrt(float(fan_in))
        w = jax.random.uniform(kw, (fan_out, fan_in), jnp.float32, -bound, bound)
        b = jax.random.uniform(kb, (fan_out,), jnp.float32, -bound, bound)
        return w, b

    w1, b1 = linear(ks[0], ks[1], code_len, hidden)      # fc1
    w2u, b2u = linear(ks[2], ks[3], hidden, code_len)    # fc2_u
    w2s, b2s = linear(ks[4], ks[5], hidden, code_len)    # fc2_s
    return {"w1": w1, "b1": b1, "w2u": w2u, "b2u": b2u, "w2s": w2s, "b2s": b2s}


def reference_forward(codes, codebook, params):
    """Pure-JAX reference (same bf16-input / f32-accum encode as the kernel)."""
    bf16 = jnp.bfloat16
    d = jnp.sum((codes[:, None, :] - codebook[None, :, :]) ** 2, axis=-1)
    prev = codebook[jnp.argmin(d, axis=1)]
    h1 = jax.nn.relu(
        jnp.dot(prev.astype(bf16), params["w1"].T.astype(bf16),
                preferred_element_type=jnp.float32) + params["b1"])
    mu = (jnp.dot(h1.astype(bf16), params["w2u"].T.astype(bf16),
                  preferred_element_type=jnp.float32) + params["b2u"])
    logstd = (jnp.dot(h1.astype(bf16), params["w2s"].T.astype(bf16),
                      preferred_element_type=jnp.float32) + params["b2s"])
    return mu, logstd, prev


if __name__ == "__main__":
    code_len = 32
    codebook_size = 64
    batch = 2
    hidden = 512

    root = jax.random.PRNGKey(0)
    k_codes, k_cb, k_params = jax.random.split(root, 3)

    codes = jax.random.normal(k_codes, (batch, code_len), jnp.float32)
    codebook = jax.random.normal(k_cb, (codebook_size, code_len), jnp.float32)
    params = init_params(k_params, code_len, hidden)

    mu, logstd, prev = slow_prior_forward(codes, codebook, params)
    jax.block_until_ready((mu, logstd, prev))

    mu_ref, logstd_ref, prev_ref = reference_forward(codes, codebook, params)
    assert mu.shape == (batch, code_len) and logstd.shape == (batch, code_len)
    assert jnp.allclose(prev, prev_ref, atol=1e-5, rtol=1e-5)
    assert jnp.allclose(mu, mu_ref, atol=2e-2, rtol=2e-2)
    assert jnp.allclose(logstd, logstd_ref, atol=2e-2, rtol=2e-2)

    print("KERNEL_OK")
</pallas_src>

<mosaic_0001>
module attributes {stable_mosaic.version = 11 : i64} {
  func.func @slow_prior_kernel(%arg0: i32, %arg1: memref<8x128xf32, #tpu.memory_space<vmem>>, %arg2: memref<128x128xf32, #tpu.memory_space<vmem>>, %arg3: memref<1x128xf32, #tpu.memory_space<vmem>>, %arg4: memref<128x512xbf16, #tpu.memory_space<vmem>>, %arg5: memref<1x512xf32, #tpu.memory_space<vmem>>, %arg6: memref<512x256xbf16, #tpu.memory_space<vmem>>, %arg7: memref<1x256xf32, #tpu.memory_space<vmem>>, %arg8: memref<8x256xf32, #tpu.memory_space<vmem>>, %arg9: memref<8x128xf32, #tpu.memory_space<vmem>>) attributes {dimension_semantics = [#tpu.dimension_semantics<parallel>], iteration_bounds = array<i64: 1>, scalar_prefetch = 0 : i64, scratch_operands = 0 : i64, tpu.core_type = #tpu.core_type<tc>, window_params = [{transform_indices = @transform_0, window_bounds = array<i64: 8, 128>}, {pipeline_mode = #tpu.pipeline_mode<synchronous>, transform_indices = @transform_1, window_bounds = array<i64: 128, 128>}, {pipeline_mode = #tpu.pipeline_mode<synchronous>, transform_indices = @transform_2, window_bounds = array<i64: 1, 128>}, {pipeline_mode = #tpu.pipeline_mode<synchronous>, transform_indices = @transform_3, window_bounds = array<i64: 128, 512>}, {pipeline_mode = #tpu.pipeline_mode<synchronous>, transform_indices = @transform_4, window_bounds = array<i64: 1, 512>}, {pipeline_mode = #tpu.pipeline_mode<synchronous>, transform_indices = @transform_5, window_bounds = array<i64: 512, 256>}, {pipeline_mode = #tpu.pipeline_mode<synchronous>, transform_indices = @transform_6, window_bounds = array<i64: 1, 256>}, {transform_indices = @transform_7, window_bounds = array<i64: 8, 256>}, {transform_indices = @transform_8, window_bounds = array<i64: 8, 128>}]} {
    %c0 = arith.constant 0 : index
    %c0_0 = arith.constant 0 : index
    %0 = vector.load %arg1[%c0, %c0_0] : memref<8x128xf32, #tpu.memory_space<vmem>>, vector<8x128xf32>
    %c0_1 = arith.constant 0 : index
    %c0_2 = arith.constant 0 : index
    %1 = vector.load %arg2[%c0_1, %c0_2] : memref<128x128xf32, #tpu.memory_space<vmem>>, vector<128x128xf32>
    %cst = arith.constant dense<0.000000e+00> : vector<8x128xf32>
    %2 = tpu.matmul %0, %1, %cst {dimension_numbers = #tpu.dot_dimension_numbers<[1], [1], [0], [0], [0, 0, 1, 0], [], []>} : vector<8x128xf32>, vector<128x128xf32>, vector<8x128xf32> -> vector<8x128xf32>
    %c0_3 = arith.constant 0 : index
    %c0_4 = arith.constant 0 : index
    %3 = vector.load %arg3[%c0_3, %c0_4] : memref<1x128xf32, #tpu.memory_space<vmem>>, vector<1x128xf32>
    %cst_5 = arith.constant 2.000000e+00 : f32
    %4 = vector.broadcast %cst_5 : f32 to vector<8x128xf32>
    %5 = arith.mulf %4, %2 : vector<8x128xf32>
    %6 = vector.broadcast %3 : vector<1x128xf32> to vector<8x128xf32>
    %7 = arith.subf %6, %5 : vector<8x128xf32>
    %8 = tpu.reduce_index %7 {axis = 1 : i32, kind = #tpu.reduction_kind<arg_min>} : vector<8x128xf32> -> vector<8xi32>
    %9 = tpu.iota {dimensions = array<i32: 1>} : vector<8x128xi32>
    %10 = vector.shape_cast %8 : vector<8xi32> to vector<8x1xi32>
    %11 = vector.broadcast %10 : vector<8x1xi32> to vector<8x128xi32>
    %12 = arith.cmpi eq, %9, %11 : vector<8x128xi32>
    %13 = arith.extui %12 : vector<8x128xi1> to vector<8x128xi32>
    %14 = arith.sitofp %13 : vector<8x128xi32> to vector<8x128xf32>
    %cst_6 = arith.constant dense<0.000000e+00> : vector<8x128xf32>
    %15 = tpu.matmul %14, %1, %cst_6 {dimension_numbers = #tpu.dot_dimension_numbers<[1], [0], [0], [1], [0, 0, 1, 1], [], []>} : vector<8x128xf32>, vector<128x128xf32>, vector<8x128xf32> -> vector<8x128xf32>
    %c0_7 = arith.constant 0 : index
    %c0_8 = arith.constant 0 : index
    %16 = vector.load %arg9[%c0_7, %c0_8] : memref<8x128xf32, #tpu.memory_space<vmem>>, vector<8x128xf32>
    tpu.vector_store %arg9[%c0_7, %c0_8], %15 {strides = array<i32>} : memref<8x128xf32, #tpu.memory_space<vmem>>, vector<8x128xf32>,
    %17 = arith.truncf %15 : vector<8x128xf32> to vector<8x128xbf16>
    %c0_9 = arith.constant 0 : index
    %c0_10 = arith.constant 0 : index
    %18 = vector.load %arg4[%c0_9, %c0_10] : memref<128x512xbf16, #tpu.memory_space<vmem>>, vector<128x512xbf16>
    %cst_11 = arith.constant dense<0.000000e+00> : vector<8x512xf32>
    %19 = tpu.matmul %17, %18, %cst_11 {dimension_numbers = #tpu.dot_dimension_numbers<[1], [0], [0], [1], [0, 0, 1, 1], [], []>} : vector<8x128xbf16>, vector<128x512xbf16>, vector<8x512xf32> -> vector<8x512xf32>
    %c0_12 = arith.constant 0 : index
    %c0_13 = arith.constant 0 : index
    %20 = vector.load %arg5[%c0_12, %c0_13] : memref<1x512xf32, #tpu.memory_space<vmem>>, vector<1x512xf32>
    %21 = vector.broadcast %20 : vector<1x512xf32> to vector<8x512xf32>
    %22 = arith.addf %19, %21 : vector<8x512xf32>
    %cst_14 = arith.constant 0.000000e+00 : f32
    %23 = vector.broadcast %cst_14 : f32 to vector<8x512xf32>
    %24 = arith.maximumf %22, %23 : vector<8x512xf32>
    %25 = arith.truncf %24 : vector<8x512xf32> to vector<8x512xbf16>
    %c0_15 = arith.constant 0 : index
    %c0_16 = arith.constant 0 : index
    %26 = vector.load %arg6[%c0_15, %c0_16] : memref<512x256xbf16, #tpu.memory_space<vmem>>, vector<512x256xbf16>
    %cst_17 = arith.constant dense<0.000000e+00> : vector<8x256xf32>
    %27 = tpu.matmul %25, %26, %cst_17 {dimension_numbers = #tpu.dot_dimension_numbers<[1], [0], [0], [1], [0, 0, 1, 1], [], []>} : vector<8x512xbf16>, vector<512x256xbf16>, vector<8x256xf32> -> vector<8x256xf32>
    %c0_18 = arith.constant 0 : index
    %c0_19 = arith.constant 0 : index
    %28 = vector.load %arg7[%c0_18, %c0_19] : memref<1x256xf32, #tpu.memory_space<vmem>>, vector<1x256xf32>
    %29 = vector.broadcast %28 : vector<1x256xf32> to vector<8x256xf32>
    %30 = arith.addf %27, %29 : vector<8x256xf32>
    %c0_20 = arith.constant 0 : index
    %c0_21 = arith.constant 0 : index
    %31 = vector.load %arg8[%c0_20, %c0_21] : memref<8x256xf32, #tpu.memory_space<vmem>>, vector<8x256xf32>
    tpu.vector_store %arg8[%c0_20, %c0_21], %30 {strides = array<i32>} : memref<8x256xf32, #tpu.memory_space<vmem>>, vector<8x256xf32>,
    return
  }
  func.func @transform_0(%arg0: i32) -> (i32, i32) {
    %c0_i32 = arith.constant 0 : i32
    %c0_i32_0 = arith.constant 0 : i32
    return %arg0, %c0_i32 : i32, i32
  }
  func.func @transform_1(%arg0: i32) -> (i32, i32) {
    %c0_i32 = arith.constant 0 : i32
    %c0_i32_0 = arith.constant 0 : i32
    %c0_i32_1 = arith.constant 0 : i32
    return %c0_i32, %c0_i32_0 : i32, i32
  }
  func.func @transform_2(%arg0: i32) -> (i32, i32) {
    %c0_i32 = arith.constant 0 : i32
    %c0_i32_0 = arith.constant 0 : i32
    %c0_i32_1 = arith.constant 0 : i32
    return %c0_i32, %c0_i32_0 : i32, i32
  }
  func.func @transform_3(%arg0: i32) -> (i32, i32) {
    %c0_i32 = arith.constant 0 : i32
    %c0_i32_0 = arith.constant 0 : i32
    %c0_i32_1 = arith.constant 0 : i32
    return %c0_i32, %c0_i32_0 : i32, i32
  }
  func.func @transform_4(%arg0: i32) -> (i32, i32) {
    %c0_i32 = arith.constant 0 : i32
    %c0_i32_0 = arith.constant 0 : i32
    %c0_i32_1 = arith.constant 0 : i32
    return %c0_i32, %c0_i32_0 : i32, i32
  }
  func.func @transform_5(%arg0: i32) -> (i32, i32) {
    %c0_i32 = arith.constant 0 : i32
    %c0_i32_0 = arith.constant 0 : i32
    %c0_i32_1 = arith.constant 0 : i32
    return %c0_i32, %c0_i32_0 : i32, i32
  }
  func.func @transform_6(%arg0: i32) -> (i32, i32) {
    %c0_i32 = arith.constant 0 : i32
    %c0_i32_0 = arith.constant 0 : i32
    %c0_i32_1 = arith.constant 0 : i32
    return %c0_i32, %c0_i32_0 : i32, i32
  }
  func.func @transform_7(%arg0: i32) -> (i32, i32) {
    %c0_i32 = arith.constant 0 : i32
    %c0_i32_0 = arith.constant 0 : i32
    return %arg0, %c0_i32 : i32, i32
  }
  func.func @transform_8(%arg0: i32) -> (i32, i32) {
    %c0_i32 = arith.constant 0 : i32
    %c0_i32_0 = arith.constant 0 : i32
    return %arg0, %c0_i32 : i32, i32
  }
}

</mosaic_0001>

<bundles_post_ra>
// kernel: tpu_custom_call.1
= control target key start
LH: loop header
LB: loop body
LE: loop exit
PB: predicated region body
PF: predicated region fallthrough
CT: control target
= control target key end

     0   :  { %14 = vsyncpa [#allocation3], 0  ;;  %s1806_s0 = inlined_call_operand.hbm [shape: f32[8,128], index: 0, kind: input, shape index: {}]   ;;  %s1807_s1 = inlined_call_operand.hbm [shape: f32[128,128], index: 1, kind: input, shape index: {}]   ;;  %s1808_s2 = inlined_call_operand.vmem [shape: f32[1,128], index: 2, kind: input, shape index: {}]   ;;  %s1809_s3 = inlined_call_operand.hbm [shape: bf16[128,512], index: 3, kind: input, shape index: {}]   ;;  %s1810_s4 = inlined_call_operand.vmem [shape: f32[1,512], index: 4, kind: input, shape index: {}]   ;;  %s1811_s5 = inlined_call_operand.hbm [shape: bf16[512,256], index: 5, kind: input, shape index: {}]   ;;  %s1812_s6 = inlined_call_operand.vmem [shape: f32[1,256], index: 6, kind: input, shape index: {}]   ;;  %s1813_s7 = inlined_call_operand.hbm [shape: f32[8,256], index: 7, kind: output, shape index: {0}]   ;;  %s1814_s8 = inlined_call_operand.hbm [shape: f32[8,128], index: 8, kind: output, shape index: {1}]  }
   0x1   :  { %15 = vsyncpa [#allocation6], 0 }
   0x2   :  { %16 = vsyncpa [#allocation9], 0 }
   0x3   :  { %17 = vsyncpa [#allocation4], 0 }
   0x4   :  { %18 = vsyncpa [#allocation12], 0  ;;  %s1632_s27 = smov [#allocation5]   ;;  %s1490_s9 = scalar_lea.hbm %s1807_s1, 2048 }
   0x5   :  { %s34_s28 = sshll.u32 %s1632_s27, 4  ;;  %p1491_p0 = scmp.ne.s32.totalorder %s1807_s1, %s1490_s9  ;;  %s35_s28 = int_to_ptr.vmem [resolvable:$true] %s34_s28 }
   0x6   :  { %p1494_p1 = scmp.lt.u32.totalorder %s1490_s9, %s1807_s1 }
   0x8   :  { %p1496_p2 = pnand %p1494_p1, %p1491_p0 }
   0xa   :  { %1499 = shalt.err (!%p1496_p2)
}
   0xb   :  { %s1500_s14 = scalar_lea.vmem %s35_s28, 2048  ;;  %p1505_p4 = scmp.lt.s32.totalorder %s35_s28, %s35_s28 }
   0xc   :  { %p1501_p3 = scmp.ne.s32.totalorder %s35_s28, %s1500_s14  ;;  %p1506_p5 = scmp.lt.s32.totalorder %s1500_s14, %s1500_s14 }
   0xe   :  { %p1507_p6 = por %p1506_p5, %p1505_p4 }
  0x10   :  { %p1508_p7 = pnand %p1507_p6, %p1501_p3 }
  0x12   :  { %1511 = shalt.err (!%p1508_p7)
}
  0x13   :  { %s1633_s15 = smov 128   ;;  %s1634_s16 = smov 8  }
  0x14   :  { %40 = dma.hbm_to_vmem [thread:$0]  %s1807_s1, 2048, %s35_s28, [#allocation6], %s1633_s15, %s1633_s15, %s1634_s16  }
  0x15   :  { %s1635_s19 = smov [#allocation2]   ;;  %s1636_s21 = smov [#allocation7]  }
  0x16   :  { %s25_s20 = sshll.u32 %s1635_s19, 4  ;;  %s48_s22 = sshll.u32 %s1636_s21, 4  ;;  %s26_s20 = int_to_ptr.vmem [resolvable:$true] %s25_s20  ;;  %s49_s22 = int_to_ptr.vmem [resolvable:$true] %s48_s22 }
  0x17   :  { %s1512_s25 = scalar_lea.hbm %s1806_s0, 128 }
  0x18   :  { %p1513_p8 = scmp.ne.s32.totalorder %s1806_s0, %s1512_s25  ;;  %p1516_p9 = scmp.lt.u32.totalorder %s1512_s25, %s1806_s0 }
  0x1a   :  { %p1518_p10 = pnand %p1516_p9, %p1513_p8 }
  0x1c   :  { %1521 = shalt.err (!%p1518_p10)
}
  0x1d   :  { %s1522_s1 = scalar_lea.vmem %s26_s20, 128  ;;  %p1527_p12 = scmp.lt.s32.totalorder %s26_s20, %s26_s20 }
  0x1e   :  { %p1523_p11 = scmp.ne.s32.totalorder %s26_s20, %s1522_s1  ;;  %p1528_p13 = scmp.lt.s32.totalorder %s1522_s1, %s1522_s1 }
  0x20   :  { %p1529_p0 = por %p1528_p13, %p1527_p12 }
  0x22   :  { %p1530_p1 = pnand %p1529_p0, %p1523_p11 }
  0x24   :  { %1533 = shalt.err (!%p1530_p1)
}
  0x25   :  { %28 = dma.hbm_to_vmem [thread:$0]  %s1806_s0, 128, %s26_s20, [#allocation3]  }
  0x26   :  { %s1534_s12 = scalar_lea.hbm %s1809_s3, 4096 }
  0x27   :  { %p1535_p2 = scmp.ne.s32.totalorder %s1809_s3, %s1534_s12  ;;  %p1538_p3 = scmp.lt.u32.totalorder %s1534_s12, %s1809_s3 }
  0x29   :  { %p1540_p4 = pnand %p1538_p3, %p1535_p2 }
  0x2b   :  { %1543 = shalt.err (!%p1540_p4)
}
  0x2c   :  { %s1544_s19 = scalar_lea.vmem %s49_s22, 4096  ;;  %p1549_p6 = scmp.lt.s32.totalorder %s49_s22, %s49_s22 }
  0x2d   :  { %p1545_p5 = scmp.ne.s32.totalorder %s49_s22, %s1544_s19  ;;  %p1550_p7 = scmp.lt.s32.totalorder %s1544_s19, %s1544_s19 }
  0x2f   :  { %p1551_p8 = por %p1550_p7, %p1549_p6 }
  0x31   :  { %p1552_p9 = pnand %p1551_p8, %p1545_p5 }
  0x33   :  { %1555 = shalt.err (!%p1552_p9)
}
  0x34   :  { %s1637_s0 = smov 256   ;;  %s1638_s20 = smov 16  }
  0x35   :  { %54 = dma.hbm_to_vmem [thread:$0]  %s1809_s3, 4096, %s49_s22, [#allocation6], %s1637_s0, %s1637_s0, %s1638_s20  }
  0x36   :  { %s1639_s24 = smov [#allocation8]   ;;  %s1556_s29 = scalar_lea.hbm %s1811_s5, 8192 }
  0x37   :  { %s62_s25 = sshll.u32 %s1639_s24, 4  ;;  %p1557_p10 = scmp.ne.s32.totalorder %s1811_s5, %s1556_s29  ;;  %s63_s25 = int_to_ptr.vmem [resolvable:$true] %s62_s25 }
  0x38   :  { %p1560_p11 = scmp.lt.u32.totalorder %s1556_s29, %s1811_s5 }
  0x3a   :  { %p1562_p12 = pnand %p1560_p11, %p1557_p10 }
  0x3c   :  { %1565 = shalt.err (!%p1562_p12)
}
  0x3d   :  { %s1566_s10 = scalar_lea.vmem %s63_s25, 8192  ;;  %p1571_p0 = scmp.lt.s32.totalorder %s63_s25, %s63_s25 }
  0x3e   :  { %p1567_p13 = scmp.ne.s32.totalorder %s63_s25, %s1566_s10  ;;  %p1572_p1 = scmp.lt.s32.totalorder %s1566_s10, %s1566_s10 }
  0x40   :  { %p1573_p2 = por %p1572_p1, %p1571_p0 }
  0x42   :  { %p1574_p3 = pnand %p1573_p2, %p1567_p13 }
  0x44   :  { %1577 = shalt.err (!%p1574_p3)
}
  0x45   :  { %68 = dma.hbm_to_vmem [thread:$0]  %s1811_s5, 8192, %s63_s25, [#allocation9], %s1633_s15, %s1633_s15, %s1634_s16  }
  0x46   :  { %1622 = dma.done.wait [#allocation3], 128  }
  0x47   :  { %1623 = vsyncadd [#allocation3], 4294967168 }
  0x48   :  { %1624 = dma.done.wait [#allocation6], 6144  }
  0x49   :  { %1625 = vsyncadd [#allocation6], 4294961152 }
  0x4a   :  { %1626 = dma.done.wait [#allocation9], 8192  }
  0x4b   :  { %1627 = vsyncadd [#allocation9], 4294959104  ;;  %v1640_v0 = vmov 0.0|0.0   ;;  %vm1641_vm0 = vmmov 0   ;;  %v1642_v1 = vmov 0.0   ;;  %v85_v2 = vld [vmem:[#allocation5] sm:$0xff]  ;;  %v182_v48 = vlaneseq }
  0x4c   :  { %1277 = vmatprep.subr.bf16.mxu0 %v1640_v0  ;;  %1239 = vmatprep.mubr.msk.f32.mxu0 %vm1641_vm0, %v1642_v1  ;;  %v86_v3 = vld [vmem:[#allocation5 + $0x8] sm:$0xff]  ;;  %v87_v5 = vld [vmem:[#allocation5 + $0x10] sm:$0xff]  ;;  %v88_v6 = vld [vmem:[#allocation5 + $0x18] sm:$0xff]  ;;  %v1643_v53 = vmov 1.0  }
  0x4d   :  { %v1278_v4 = vpack.c.bf16 %v86_v3, %v85_v2  ;;  %v1281_v7 = vpack.c.bf16 %v88_v6, %v87_v5  ;;  %v89_v8 = vld [vmem:[#allocation5 + $0x20] sm:$0xff]  ;;  %v90_v9 = vld [vmem:[#allocation5 + $0x28] sm:$0xff]  ;;  %v91_v11 = vld [vmem:[#allocation5 + $0x30] sm:$0xff]  ;;  %v183_v49 = vand.u32 127, %v182_v48 }
  0x4e   :  { %v1284_v10 = vpack.c.bf16 %v90_v9, %v89_v8  ;;  %v92_v12 = vld [vmem:[#allocation5 + $0x38] sm:$0xff]  ;;  %v93_v14 = vld [vmem:[#allocation5 + $0x40] sm:$0xff]  ;;  %v94_v15 = vld [vmem:[#allocation5 + $0x48] sm:$0xff] }
  0x4f   :  { %1279 = vmatpush3.bf16.xpose.msra.mxu0 %v1278_v4  ;;  %v1287_v13 = vpack.c.bf16 %v92_v12, %v91_v11  ;;  %v1290_v16 = vpack.c.bf16 %v94_v15, %v93_v14  ;;  %v95_v17 = vld [vmem:[#allocation5 + $0x50] sm:$0xff]  ;;  %v96_v18 = vld [vmem:[#allocation5 + $0x58] sm:$0xff]  ;;  %v97_v20 = vld [vmem:[#allocation5 + $0x60] sm:$0xff] }
  0x50   :  { %1280 = vmatprep.subr.bf16.mxu0 %v1640_v0  ;;  %v1293_v19 = vpack.c.bf16 %v96_v18, %v95_v17  ;;  %v98_v21 = vld [vmem:[#allocation5 + $0x68] sm:$0xff]  ;;  %v99_v23 = vld [vmem:[#allocation5 + $0x70] sm:$0xff]  ;;  %v100_v24 = vld [vmem:[#allocation5 + $0x78] sm:$0xff] }
  0x51   :  { %v1296_v22 = vpack.c.bf16 %v98_v21, %v97_v20  ;;  %v1299_v25 = vpack.c.bf16 %v100_v24, %v99_v23  ;;  %v84_v26 = vld [vmem:[#allocation2] sm:$0xff]  ;;  %v1346_v32 = vld [vmem:[#allocation7 + $0x4] ss:$16 sps:$4 sm:$0xff]   ;;  %v1351_v34 = vld [vmem:[#allocation7] ss:$16 sps:$4 sm:$0xff]  }
  0x52   :  { %v1074_v28 = vld [vmem:[%s1808_s2] ss:$0 sm:$0xff]  ;;  %v1350_v33 = vld [vmem:[#allocation7 + $0xc] ss:$16 sps:$4 sm:$0xff]   ;;  %v1352_v35 = vld [vmem:[#allocation7 + $0x24] ss:$16 sps:$4 sm:$0xff]   ;;  %473 = vmatprep.subr.bf16.mxu1 %v1346_v32 }
  0x53   :  { %474 = vmatpush1.bf16.msra.mxu1 %v1351_v34  ;;  %v1357_v36 = vld [vmem:[#allocation7 + $0x20] ss:$16 sps:$4 sm:$0xff]   ;;  %v1358_v37 = vld [vmem:[#allocation7 + $0x44] ss:$16 sps:$4 sm:$0xff]   ;;  %v1348_v50 = vld [vmem:[#allocation7 + $0x8] ss:$16 sps:$4 sm:$0xff]  }
  0x54   :  { %475 = vmatprep.subr.bf16.mxu1 %v1352_v35  ;;  %v1363_v38 = vld [vmem:[#allocation7 + $0x40] ss:$16 sps:$4 sm:$0xff]   ;;  %v1364_v39 = vld [vmem:[#allocation7 + $0x64] ss:$16 sps:$4 sm:$0xff]   ;;  %v1356_v52 = vld [vmem:[#allocation7 + $0x2c] ss:$16 sps:$4 sm:$0xff]  }
  0x55   :  { %v1369_v40 = vld [vmem:[#allocation7 + $0x60] ss:$16 sps:$4 sm:$0xff]   ;;  %v1370_v41 = vld [vmem:[#allocation7 + $0x84] ss:$16 sps:$4 sm:$0xff]   ;;  %v1354_v54 = vld [vmem:[#allocation7 + $0x28] ss:$16 sps:$4 sm:$0xff]  }
  0x56   :  { %v1375_v42 = vld [vmem:[#allocation7 + $0x80] ss:$16 sps:$4 sm:$0xff]   ;;  %v1376_v43 = vld [vmem:[#allocation7 + $0xa4] ss:$16 sps:$4 sm:$0xff]   ;;  %v1362_v55 = vld [vmem:[#allocation7 + $0x4c] ss:$16 sps:$4 sm:$0xff]  }
  0x57   :  { %1282 = vmatpush3.bf16.xpose.msra.mxu0 %v1281_v7  ;;  %476 = vmatpush1.bf16.msra.mxu1 %v1357_v36  ;;  %v1381_v44 = vld [vmem:[#allocation7 + $0xa0] ss:$16 sps:$4 sm:$0xff]   ;;  %v1382_v45 = vld [vmem:[#allocation7 + $0xc4] ss:$16 sps:$4 sm:$0xff]   ;;  %v1360_v56 = vld [vmem:[#allocation7 + $0x48] ss:$16 sps:$4 sm:$0xff]  }
  0x58   :  { %1283 = vmatprep.subr.bf16.mxu0 %v1640_v0  ;;  %477 = vmatprep.subr.bf16.mxu1 %v1358_v37  ;;  %v1387_v46 = vld [vmem:[#allocation7 + $0xc0] ss:$16 sps:$4 sm:$0xff]   ;;  %v1388_v47 = vld [vmem:[#allocation7 + $0xe4] ss:$16 sps:$4 sm:$0xff]   ;;  %v1368_v57 = vld [vmem:[#allocation7 + $0x6c] ss:$16 sps:$4 sm:$0xff]  }
  0x59   :  { %v1366_v58 = vld [vmem:[#allocation7 + $0x68] ss:$16 sps:$4 sm:$0xff]   ;;  %v1374_v59 = vld [vmem:[#allocation7 + $0x8c] ss:$16 sps:$4 sm:$0xff]   ;;  %v1393_v3 = vld [vmem:[#allocation7 + $0xe0] ss:$16 sps:$4 sm:$0xff]  }
  0x5a   :  { %v1372_v60 = vld [vmem:[#allocation7 + $0x88] ss:$16 sps:$4 sm:$0xff]   ;;  %v1380_v61 = vld [vmem:[#allocation7 + $0xac] ss:$16 sps:$4 sm:$0xff]  }
  0x5b   :  { %478 = vmatpush1.bf16.msra.mxu1 %v1363_v38  ;;  %v1378_v62 = vld [vmem:[#allocation7 + $0xa8] ss:$16 sps:$4 sm:$0xff]   ;;  %v1386_v63 = vld [vmem:[#allocation7 + $0xcc] ss:$16 sps:$4 sm:$0xff]  }
  0x5c   :  { %479 = vmatprep.subr.bf16.mxu1 %v1364_v39  ;;  %v1390_v2 = vld [vmem:[#allocation7 + $0xe8] ss:$16 sps:$4 sm:$0xff]   ;;  %v1396_v5 = vld [vmem:[#allocation8 + $0x4] ss:$8 sps:$4 sm:$0xff]   ;;  %v1405_v14 = vld [vmem:[#allocation8 + $0x34] ss:$8 sps:$4 sm:$0xff]  }
  0x5d   :  { %v1397_v11 = vld [vmem:[#allocation8 + $0x10] ss:$8 sps:$4 sm:$0xff]   ;;  %v1402_v12 = vld [vmem:[#allocation8 + $0x24] ss:$8 sps:$4 sm:$0xff]   ;;  %v1406_v17 = vld [vmem:[#allocation8 + $0x40] ss:$8 sps:$4 sm:$0xff]  }
  0x5e   :  { %v1403_v15 = vld [vmem:[#allocation8 + $0x30] ss:$8 sps:$4 sm:$0xff]   ;;  %v1411_v18 = vld [vmem:[#allocation8 + $0x54] ss:$8 sps:$4 sm:$0xff]   ;;  %v1414_v20 = vld [vmem:[#allocation8 + $0x64] ss:$8 sps:$4 sm:$0xff]  }
  0x5f   :  { %1285 = vmatpush3.bf16.xpose.msra.mxu0 %v1284_v10  ;;  %480 = vmatpush1.bf16.msra.mxu1 %v1369_v40  ;;  %v1412_v21 = vld [vmem:[#allocation8 + $0x60] ss:$8 sps:$4 sm:$0xff]   ;;  %v1415_v23 = vld [vmem:[#allocation8 + $0x70] ss:$8 sps:$4 sm:$0xff]   ;;  %v1420_v24 = vld [vmem:[#allocation8 + $0x84] ss:$8 sps:$4 sm:$0xff]  }
  0x60   :  { %1286 = vmatprep.subr.bf16.mxu0 %v1640_v0  ;;  %481 = vmatprep.subr.bf16.mxu1 %v1370_v41  ;;  %v1432_v32 = vld [vmem:[#allocation8 + $0xc4] ss:$8 sps:$4 sm:$0xff]   ;;  %v1435_v34 = vld [vmem:[#allocation8 + $0xd4] ss:$8 sps:$4 sm:$0xff]   ;;  %v1433_v35 = vld [vmem:[#allocation8 + $0xd0] ss:$8 sps:$4 sm:$0xff]  }
  0x61   :  { %v1438_v36 = vld [vmem:[#allocation8 + $0xe4] ss:$8 sps:$4 sm:$0xff]   ;;  %v1436_v37 = vld [vmem:[#allocation8 + $0xe0] ss:$8 sps:$4 sm:$0xff]   ;;  %v1441_v38 = vld [vmem:[#allocation8 + $0xf4] ss:$8 sps:$4 sm:$0xff]  }
  0x62   :  { %v1439_v39 = vld [vmem:[#allocation8 + $0xf0] ss:$8 sps:$4 sm:$0xff]   ;;  %v1444_v40 = vld [vmem:[#allocation8 + $0x104] ss:$8 sps:$4 sm:$0xff]   ;;  %v1753_v41 = vshrl.u32 %v182_v48, 7 }
  0x63   :  { %482 = vmatpush1.bf16.msra.mxu1 %v1375_v42 }
  0x64   :  { %483 = vmatprep.subr.bf16.mxu1 %v1376_v43  ;;  %v295_v42 = vsub.s32 0, %v1753_v41  ;;  %v1759_v43 = vld [vmem:[%s1810_s4] sm:$0xf]  ;;  %s1645_s4 = smov [#allocation11]  }
  0x65   :  { %s1059_s11 = sshll.u32 %s1645_s4, 4  ;;  %s1060_s11 = int_to_ptr.vmem [resolvable:$true] %s1059_s11 }
  0x66   :  { %s1578_s12 = scalar_lea.vmem %s1060_s11, 128  ;;  %p1583_p5 = scmp.lt.s32.totalorder %s1060_s11, %s1060_s11 }
  0x67   :  { %1288 = vmatpush3.bf16.xpose.msra.mxu0 %v1287_v13  ;;  %484 = vmatpush1.bf16.msra.mxu1 %v1381_v44  ;;  %v299_v44 = vsub.s32 1, %v1753_v41  ;;  %p1579_p4 = scmp.ne.s32.totalorder %s1060_s11, %s1578_s12  ;;  %p1584_p6 = scmp.lt.s32.totalorder %s1578_s12, %s1578_s12 }
  0x68   :  { %1289 = vmatprep.subr.bf16.mxu0 %v1640_v0  ;;  %485 = vmatprep.subr.bf16.mxu1 %v1382_v45  ;;  %v307_v45 = vsub.s32 3, %v1753_v41 }
  0x69   :  { %p1585_p7 = por %p1584_p6, %p1583_p5 }
  0x6a   :  { %v308_v48 = vrot.slane %v1759_v43, %v307_v45 }
  0x6b   :  { %486 = vmatpush1.bf16.msra.mxu1 %v1387_v46  ;;  %v296_v46 = vrot.slane %v1759_v43, %v295_v42  ;;  %p1586_p8 = pnand %p1585_p7, %p1579_p4 }
  0x6c   :  { %487 = vmatprep.subr.bf16.mxu1 %v1388_v47  ;;  %v300_v47 = vrot.slane %v1759_v43, %v299_v44 }
  0x6f   :  { %1291 = vmatpush3.bf16.xpose.msra.mxu0 %v1290_v16  ;;  %488 = vmatpush1.bf16.msra.mxu1 %v1393_v3 }
  0x70   :  { %1292 = vmatprep.subr.bf16.mxu0 %v1640_v0  ;;  %959 = vmatprep.subr.bf16.mxu1 %v1396_v5  ;;  %v1450_v5 = vld [vmem:[#allocation8 + $0x124] ss:$8 sps:$4 sm:$0xff]  }
  0x77   :  { %1294 = vmatpush3.bf16.xpose.msra.mxu0 %v1293_v19 }
  0x78   :  { %1295 = vmatprep.subr.bf16.mxu0 %v1640_v0 }
  0x7f   :  { %1297 = vmatpush3.bf16.xpose.msra.mxu0 %v1296_v22 }
  0x80   :  { %1298 = vmatprep.subr.bf16.mxu0 %v1640_v0 }
  0x87   :  { %1300 = vmatpush3.bf16.xpose.msra.mxu0 %v1299_v25 }
  0x88   :  { %1301 = vmatprep.subr.bf16.mxu0 %v1640_v0 }
  0x8e   :  { %1240 = vmatmul.mubr.f32.vlgmr.msra.gmra.mrb[0].mxu0 %v84_v26  ;;  %v1423_v26 = vld [vmem:[#allocation8 + $0x94] ss:$8 sps:$4 sm:$0xff]  }
  0x8f   :  { %1303 = vmatpush3.bf16.msra.mxu0 %v1278_v4  ;;  %1274 = vmatprep.mubr.msk.f32.mxu0 %vm1641_vm0, %v1642_v1  ;;  %v1392_v1 = vld [vmem:[#allocation7 + $0xec] ss:$16 sps:$4 sm:$0xff]   ;;  %v1644_v4 = vmov 0  }
  0x90   :  { %1304 = vmatprep.subr.bf16.mxu0 %v1640_v0  ;;  %505 = vmatprep.mubr.bf16.mxu1 %v1644_v4 }
  0x93   :  { %1306 = vmatpush3.bf16.msra.mxu0 %v1281_v7  ;;  %v1394_v7 = vld [vmem:[#allocation8] ss:$8 sps:$4 sm:$0xff]  }
  0x94   :  { %1307 = vmatprep.subr.bf16.mxu0 %v1640_v0 }
  0x97   :  { %1309 = vmatpush3.bf16.msra.mxu0 %v1284_v10  ;;  %v1399_v10 = vld [vmem:[#allocation8 + $0x14] ss:$8 sps:$4 sm:$0xff]  }
  0x98   :  { %1310 = vmatprep.subr.bf16.mxu0 %v1640_v0 }
  0x9b   :  { %1312 = vmatpush3.bf16.msra.mxu0 %v1287_v13  ;;  %v1400_v13 = vld [vmem:[#allocation8 + $0x20] ss:$8 sps:$4 sm:$0xff]  }
  0x9c   :  { %1313 = vmatprep.subr.bf16.mxu0 %v1640_v0 }
  0x9f   :  { %1315 = vmatpush3.bf16.msra.mxu0 %v1290_v16  ;;  %v1408_v16 = vld [vmem:[#allocation8 + $0x44] ss:$8 sps:$4 sm:$0xff]  }
  0xa0   :  { %1316 = vmatprep.subr.bf16.mxu0 %v1640_v0 }
  0xa3   :  { %1318 = vmatpush3.bf16.msra.mxu0 %v1293_v19  ;;  %v1409_v19 = vld [vmem:[#allocation8 + $0x50] ss:$8 sps:$4 sm:$0xff]  }
  0xa4   :  { %1319 = vmatprep.subr.bf16.mxu0 %v1640_v0 }
  0xa7   :  { %1321 = vmatpush3.bf16.msra.mxu0 %v1296_v22  ;;  %v1417_v22 = vld [vmem:[#allocation8 + $0x74] ss:$8 sps:$4 sm:$0xff]  }
  0xa8   :  { %1322 = vmatprep.subr.bf16.mxu0 %v1640_v0  ;;  %v1384_v0 = vld [vmem:[#allocation7 + $0xc8] ss:$16 sps:$4 sm:$0xff]  }
  0xab   :  { %1324 = vmatpush3.bf16.msra.mxu0 %v1299_v25  ;;  %v1418_v25 = vld [vmem:[#allocation8 + $0x80] ss:$8 sps:$4 sm:$0xff]  }
  0xac   :  { %514 = vmatprep.subr.bf16.mxu0 %v1350_v33  ;;  %v1430_v33 = vld [vmem:[#allocation8 + $0xc0] ss:$8 sps:$4 sm:$0xff]  }
 0x161   :  { %v167_v27 = vpop.f32.mrb[0].mxu0 }
 0x162   :  { %v172_v29 = vmul.f32 2.0, %v167_v27  ;;  %v1241_v30 = vpop.f32.mrb[1].mxu0  ;;  %v1421_v27 = vld [vmem:[#allocation8 + $0x90] ss:$8 sps:$4 sm:$0xff]  }
 0x163   :  { %v1429_v30 = vld [vmem:[#allocation8 + $0xb4] ss:$8 sps:$4 sm:$0xff]  }
 0x164   :  { %v179_v31 = vsub.f32 %v1074_v28, %v172_v29  ;;  %v1426_v28 = vld [vmem:[#allocation8 + $0xa4] ss:$8 sps:$4 sm:$0xff]   ;;  %v1424_v29 = vld [vmem:[#allocation8 + $0xa0] ss:$8 sps:$4 sm:$0xff]  }
 0x166   :  { %180 = vmin.index.xlane.f32.xlu0 %v179_v31  ;;  %v1427_v31 = vld [vmem:[#allocation8 + $0xb0] ss:$8 sps:$4 sm:$0xff]  }
 0x1f3   :  { %v181_v51 = vpop.xlane.xlu0 %180 }
 0x1f4   :  { %vm184_vm1 = vcmp.eq.s32.totalorder %v183_v49, %v181_v51 }
 0x1f5   :  { %1275 = vmatmul.mubr.msk.f32.vlgmr.msra.gmra.mrb[2].mxu0 %vm184_vm1, %v1643_v53 }
 0x1f6   :  { %515 = vmatpush1.bf16.msra.mxu0 %v1348_v50  ;;  %546 = vmatprep.mubr.bf16.mxu0 %v1644_v4  ;;  %v1445_v4 = vld [vmem:[#allocation8 + $0x110] ss:$8 sps:$4 sm:$0xff]  }
 0x1f7   :  { %516 = vmatprep.subr.bf16.mxu0 %v1356_v52 }
 0x1fa   :  { %517 = vmatpush1.bf16.msra.mxu0 %v1354_v54 }
 0x1fb   :  { %518 = vmatprep.subr.bf16.mxu0 %v1362_v55 }
 0x1fe   :  { %519 = vmatpush1.bf16.msra.mxu0 %v1360_v56 }
 0x1ff   :  { %520 = vmatprep.subr.bf16.mxu0 %v1368_v57 }
 0x202   :  { %521 = vmatpush1.bf16.msra.mxu0 %v1366_v58 }
 0x203   :  { %522 = vmatprep.subr.bf16.mxu0 %v1374_v59 }
 0x206   :  { %523 = vmatpush1.bf16.msra.mxu0 %v1372_v60 }
 0x207   :  { %524 = vmatprep.subr.bf16.mxu0 %v1380_v61 }
 0x20a   :  { %525 = vmatpush1.bf16.msra.mxu0 %v1378_v62 }
 0x20b   :  { %526 = vmatprep.subr.bf16.mxu0 %v1386_v63 }
 0x20e   :  { %527 = vmatpush1.bf16.msra.mxu0 %v1384_v0  ;;  %v1442_v0 = vld [vmem:[#allocation8 + $0x100] ss:$8 sps:$4 sm:$0xff]  }
 0x20f   :  { %528 = vmatprep.subr.bf16.mxu0 %v1392_v1 }
 0x212   :  { %529 = vmatpush1.bf16.msra.mxu0 %v1390_v2  ;;  %v1447_v2 = vld [vmem:[#allocation8 + $0x114] ss:$8 sps:$4 sm:$0xff]  }
 0x2c8   :  { %v253_v6 = vpop.f32.mrb[2].mxu0 }
 0x2c9   :  { %v258_v8 = vpack.c.bf16 %v253_v6, %v253_v6  ;;  %257 = vst [vmem:[#allocation11] sm:$0xff] %v253_v6  ;;  %v1276_v9 = vpop.f32.mrb[3].mxu0  ;;  %v1448_v6 = vld [vmem:[#allocation8 + $0x120] ss:$8 sps:$4 sm:$0xff]  }
 0x2ca   :  { %v1456_v9 = vld [vmem:[#allocation8 + $0x144] ss:$8 sps:$4 sm:$0xff]  }
 0x2cb   :  { %506 = vmatmul.mubr.bf16.vlgmr.msra.gmra.mrb[0].mxu1 %v258_v8  ;;  %547 = vmatmul.mubr.bf16.vlgmr.msra.gmra.mrb[4].mxu0 %v258_v8  ;;  %v1451_v8 = vld [vmem:[#allocation8 + $0x130] ss:$8 sps:$4 sm:$0xff]  }
 0x2cc   :  { %960 = vmatpush1.bf16.msra.mxu1 %v1394_v7  ;;  %v1453_v7 = vld [vmem:[#allocation8 + $0x134] ss:$8 sps:$4 sm:$0xff]  }
 0x2cd   :  { %961 = vmatprep.subr.bf16.mxu1 %v1399_v10  ;;  %v1454_v10 = vld [vmem:[#allocation8 + $0x140] ss:$8 sps:$4 sm:$0xff]  }
 0x2d0   :  { %962 = vmatpush1.bf16.msra.mxu1 %v1397_v11  ;;  %v1459_v11 = vld [vmem:[#allocation8 + $0x154] ss:$8 sps:$4 sm:$0xff]  }
 0x2d1   :  { %963 = vmatprep.subr.bf16.mxu1 %v1402_v12  ;;  %v1457_v12 = vld [vmem:[#allocation8 + $0x150] ss:$8 sps:$4 sm:$0xff]  }
 0x2d4   :  { %964 = vmatpush1.bf16.msra.mxu1 %v1400_v13  ;;  %v1462_v13 = vld [vmem:[#allocation8 + $0x164] ss:$8 sps:$4 sm:$0xff]  }
 0x2d5   :  { %965 = vmatprep.subr.bf16.mxu1 %v1405_v14  ;;  %v1460_v14 = vld [vmem:[#allocation8 + $0x160] ss:$8 sps:$4 sm:$0xff]  }
 0x2d8   :  { %966 = vmatpush1.bf16.msra.mxu1 %v1403_v15  ;;  %v1465_v15 = vld [vmem:[#allocation8 + $0x174] ss:$8 sps:$4 sm:$0xff]  }
 0x2d9   :  { %967 = vmatprep.subr.bf16.mxu1 %v1408_v16  ;;  %v1463_v16 = vld [vmem:[#allocation8 + $0x170] ss:$8 sps:$4 sm:$0xff]  }
 0x2dc   :  { %968 = vmatpush1.bf16.msra.mxu1 %v1406_v17  ;;  %v1468_v17 = vld [vmem:[#allocation8 + $0x184] ss:$8 sps:$4 sm:$0xff]  }
 0x2dd   :  { %969 = vmatprep.subr.bf16.mxu1 %v1411_v18  ;;  %v1466_v18 = vld [vmem:[#allocation8 + $0x180] ss:$8 sps:$4 sm:$0xff]  }
 0x2e0   :  { %970 = vmatpush1.bf16.msra.mxu1 %v1409_v19  ;;  %v1471_v19 = vld [vmem:[#allocation8 + $0x194] ss:$8 sps:$4 sm:$0xff]  }
 0x2e1   :  { %971 = vmatprep.subr.bf16.mxu1 %v1414_v20  ;;  %v1469_v20 = vld [vmem:[#allocation8 + $0x190] ss:$8 sps:$4 sm:$0xff]  }
 0x2e4   :  { %972 = vmatpush1.bf16.msra.mxu1 %v1412_v21  ;;  %v1474_v21 = vld [vmem:[#allocation8 + $0x1a4] ss:$8 sps:$4 sm:$0xff]  }
 0x2e5   :  { %973 = vmatprep.subr.bf16.mxu1 %v1417_v22  ;;  %v1472_v22 = vld [vmem:[#allocation8 + $0x1a0] ss:$8 sps:$4 sm:$0xff]  }
 0x2e8   :  { %974 = vmatpush1.bf16.msra.mxu1 %v1415_v23  ;;  %v1477_v23 = vld [vmem:[#allocation8 + $0x1b4] ss:$8 sps:$4 sm:$0xff]  }
 0x2e9   :  { %975 = vmatprep.subr.bf16.mxu1 %v1420_v24  ;;  %v1475_v24 = vld [vmem:[#allocation8 + $0x1b0] ss:$8 sps:$4 sm:$0xff]  }
 0x2ec   :  { %976 = vmatpush1.bf16.msra.mxu1 %v1418_v25  ;;  %v1480_v25 = vld [vmem:[#allocation8 + $0x1c4] ss:$8 sps:$4 sm:$0xff]  }
 0x2ed   :  { %977 = vmatprep.subr.bf16.mxu1 %v1423_v26  ;;  %v1478_v26 = vld [vmem:[#allocation8 + $0x1c0] ss:$8 sps:$4 sm:$0xff]  }
 0x2f0   :  { %978 = vmatpush1.bf16.msra.mxu1 %v1421_v27  ;;  %v303_v27 = vsub.s32 2, %v1753_v41 }
 0x2f1   :  { %979 = vmatprep.subr.bf16.mxu1 %v1426_v28  ;;  %v1483_v28 = vld [vmem:[#allocation8 + $0x1d4] ss:$8 sps:$4 sm:$0xff]  }
 0x2f4   :  { %980 = vmatpush1.bf16.msra.mxu1 %v1424_v29  ;;  %v1481_v29 = vld [vmem:[#allocation8 + $0x1d0] ss:$8 sps:$4 sm:$0xff]  }
 0x2f5   :  { %981 = vmatprep.subr.bf16.mxu1 %v1429_v30  ;;  %v304_v30 = vrot.slane %v1759_v43, %v303_v27 }
 0x2f8   :  { %982 = vmatpush1.bf16.msra.mxu1 %v1427_v31  ;;  %v1486_v31 = vld [vmem:[#allocation8 + $0x1e4] ss:$8 sps:$4 sm:$0xff]  }
 0x2f9   :  { %983 = vmatprep.subr.bf16.mxu1 %v1432_v32  ;;  %v1484_v32 = vld [vmem:[#allocation8 + $0x1e0] ss:$8 sps:$4 sm:$0xff]  }
 0x2fc   :  { %984 = vmatpush1.bf16.msra.mxu1 %v1430_v33 }
 0x2fd   :  { %985 = vmatprep.subr.bf16.mxu1 %v1435_v34  ;;  %v1489_v34 = vld [vmem:[#allocation8 + $0x1f4] ss:$8 sps:$4 sm:$0xff]  }
 0x300   :  { %986 = vmatpush1.bf16.msra.mxu1 %v1433_v35  ;;  %v1487_v35 = vld [vmem:[#allocation8 + $0x1f0] ss:$8 sps:$4 sm:$0xff]  }
 0x301   :  { %987 = vmatprep.subr.bf16.mxu1 %v1438_v36 }
 0x304   :  { %988 = vmatpush1.bf16.msra.mxu1 %v1436_v37 }
 0x305   :  { %989 = vmatprep.subr.bf16.mxu1 %v1441_v38 }
 0x308   :  { %990 = vmatpush1.bf16.msra.mxu1 %v1439_v39 }
 0x309   :  { %1000 = vmatprep.subr.bf16.mxu1 %v1444_v40 }
 0x39e   :  { %v507_v49 = vpop.f32.mrb[0].mxu1  ;;  %v1770_v50 = vpop.f32.mrb[4].mxu0 }
 0x39f   :  { %v508_v51 = vadd.f32 %v507_v49, %v296_v46  ;;  %v509_v52 = vpop.f32.mrb[1].mxu1  ;;  %v550_v53 = vpop.f32.mrb[5].mxu0  ;;  %v549_v33 = vadd.f32 %v1770_v50, %v304_v30 }
 0x3a0   :  { %v510_v54 = vadd.f32 %v509_v52, %v300_v47  ;;  %v551_v55 = vadd.f32 %v550_v53, %v308_v48  ;;  %v511_v56 = vpop.f32.mrb[2].mxu1  ;;  %v552_v57 = vpop.f32.mrb[6].mxu0 }
 0x3a1   :  { %v555_v58 = vmax.f32 %v508_v51, 0.0  ;;  %v512_v59 = vpop.f32.mrb[3].mxu1  ;;  %v553_v60 = vpop.f32.mrb[7].mxu0  ;;  %v557_v36 = vmax.f32 %v549_v33, 0.0 }
 0x3a2   :  { %v556_v61 = vmax.f32 %v510_v54, 0.0  ;;  %v558_v62 = vmax.f32 %v551_v55, 0.0 }
 0x3a3   :  { %v559_v1 = vpack.c.bf16 %v555_v58, %v555_v58  ;;  %v561_v37 = vpack.c.bf16 %v557_v36, %v557_v36 }
 0x3a4   :  { %v560_v63 = vpack.c.bf16 %v556_v61, %v556_v61  ;;  %v562_v3 = vpack.c.bf16 %v558_v62, %v558_v62 }
 0x3a6   :  { %991 = vmatprep.mubr.bf16.mxu1 %v560_v63 }
 0x3a7   :  { %992 = vmatmul.mubr.bf16.vlgmr.msra.gmra.mrb[4].mxu1 %v559_v1 }
 0x3a8   :  { %1001 = vmatpush1.bf16.msra.mxu1 %v1442_v0  ;;  %1032 = vmatprep.mubr.bf16.mxu1 %v562_v3 }
 0x3a9   :  { %1002 = vmatprep.subr.bf16.mxu1 %v1447_v2 }
 0x3ac   :  { %1003 = vmatpush1.bf16.msra.mxu1 %v1445_v4 }
 0x3ad   :  { %1004 = vmatprep.subr.bf16.mxu1 %v1450_v5 }
 0x3b0   :  { %1005 = vmatpush1.bf16.msra.mxu1 %v1448_v6 }
 0x3b1   :  { %1006 = vmatprep.subr.bf16.mxu1 %v1453_v7 }
 0x3b4   :  { %1007 = vmatpush1.bf16.msra.mxu1 %v1451_v8 }
 0x3b5   :  { %1008 = vmatprep.subr.bf16.mxu1 %v1456_v9 }
 0x3b8   :  { %1009 = vmatpush1.bf16.msra.mxu1 %v1454_v10 }
 0x3b9   :  { %1010 = vmatprep.subr.bf16.mxu1 %v1459_v11 }
 0x3bc   :  { %1011 = vmatpush1.bf16.msra.mxu1 %v1457_v12 }
 0x3bd   :  { %1012 = vmatprep.subr.bf16.mxu1 %v1462_v13 }
 0x3c0   :  { %1013 = vmatpush1.bf16.msra.mxu1 %v1460_v14 }
 0x3c1   :  { %1014 = vmatprep.subr.bf16.mxu1 %v1465_v15 }
 0x3c4   :  { %1015 = vmatpush1.bf16.msra.mxu1 %v1463_v16 }
 0x3c5   :  { %1016 = vmatprep.subr.bf16.mxu1 %v1468_v17 }
 0x3c8   :  { %1017 = vmatpush1.bf16.msra.mxu1 %v1466_v18 }
 0x3c9   :  { %1018 = vmatprep.subr.bf16.mxu1 %v1471_v19 }
 0x3cc   :  { %1019 = vmatpush1.bf16.msra.mxu1 %v1469_v20 }
 0x3cd   :  { %1020 = vmatprep.subr.bf16.mxu1 %v1474_v21 }
 0x3d0   :  { %1021 = vmatpush1.bf16.msra.mxu1 %v1472_v22 }
 0x3d1   :  { %1022 = vmatprep.subr.bf16.mxu1 %v1477_v23 }
 0x3d4   :  { %1023 = vmatpush1.bf16.msra.mxu1 %v1475_v24 }
 0x3d5   :  { %1024 = vmatprep.subr.bf16.mxu1 %v1480_v25 }
 0x3d8   :  { %1025 = vmatpush1.bf16.msra.mxu1 %v1478_v26 }
 0x3d9   :  { %1026 = vmatprep.subr.bf16.mxu1 %v1483_v28 }
 0x3dc   :  { %1027 = vmatpush1.bf16.msra.mxu1 %v1481_v29 }
 0x3dd   :  { %1028 = vmatprep.subr.bf16.mxu1 %v1486_v31 }
 0x3e0   :  { %1029 = vmatpush1.bf16.msra.mxu1 %v1484_v32 }
 0x3e1   :  { %1030 = vmatprep.subr.bf16.mxu1 %v1489_v34 }
 0x3e4   :  { %1031 = vmatpush1.bf16.msra.mxu1 %v1487_v35 }
 0x3e7   :  { %1033 = vmatmul.mubr.bf16.vlgmr.msra.gmra.mrb[4].mxu1 %v561_v37 }
 0x3e8   :  { %1589 = shalt.err (!%p1586_p8)
}
 0x3e9   :  { %s1590_s17 = scalar_lea.hbm %s1814_s8, 128 }
 0x3ea   :  { %p1591_p9 = scmp.ne.s32.totalorder %s1814_s8, %s1590_s17  ;;  %p1594_p10 = scmp.lt.u32.totalorder %s1590_s17, %s1814_s8 }
 0x3ec   :  { %p1596_p11 = pnand %p1594_p10, %p1591_p9 }
 0x3ee   :  { %1599 = shalt.err (!%p1596_p11)
}
 0x3ef   :  { %1062 = dma.vmem_to_hbm [thread:$0]  %s1060_s11, 128, %s1814_s8, [#allocation12]   ;;  %v627_v38 = vld [vmem:[%s1812_s6] sm:$0x3] }
 0x3f0   :  { %v632_v39 = vrot.slane %v627_v38, %v295_v42  ;;  %v636_v40 = vrot.slane %v627_v38, %v299_v44  ;;  %s1646_s26 = smov [#allocation10]  }
 0x3f1   :  { %s1049_s27 = sshll.u32 %s1646_s26, 4  ;;  %s1050_s27 = int_to_ptr.vmem [resolvable:$true] %s1049_s27 }
 0x3f2   :  { %s1600_s8 = scalar_lea.vmem %s1050_s27, 256  ;;  %p1605_p13 = scmp.lt.s32.totalorder %s1050_s27, %s1050_s27 }
 0x3f3   :  { %p1601_p12 = scmp.ne.s32.totalorder %s1050_s27, %s1600_s8  ;;  %p1606_p0 = scmp.lt.s32.totalorder %s1600_s8, %s1600_s8 }
 0x3f5   :  { %p1607_p1 = por %p1606_p0, %p1605_p13 }
 0x3f7   :  { %p1608_p2 = pnand %p1607_p1, %p1601_p12 }
 0x4ba   :  { %v1034_v43 = vpop.f32.mrb[4].mxu1 }
 0x4bb   :  { %v1325_v45 = vadd.f32 %v1034_v43, %v632_v39  ;;  %v1036_v46 = vpop.f32.mrb[5].mxu1 }
 0x4bc   :  { %v1326_v47 = vadd.f32 %v1036_v46, %v636_v40  ;;  %v1038_v48 = vpop.f32.mrb[6].mxu1 }
 0x4bd   :  { %1041 = vst [vmem:[#allocation10] sm:$0xff] %v1325_v45  ;;  %v1039_v49 = vpop.f32.mrb[7].mxu1 }
 0x4be   :  { %1042 = vst [vmem:[#allocation10 + $0x8] sm:$0xff] %v1326_v47 }
 0x4bf   :  { %1611 = shalt.err (!%p1608_p2)
}
 0x4c0   :  { %s1612_s30 = scalar_lea.hbm %s1813_s7, 256 }
 0x4c1   :  { %p1613_p3 = scmp.ne.s32.totalorder %s1813_s7, %s1612_s30  ;;  %p1616_p4 = scmp.lt.u32.totalorder %s1612_s30, %s1813_s7 }
 0x4c3   :  { %p1618_p5 = pnand %p1616_p4, %p1613_p3 }
 0x4c5   :  { %1621 = shalt.err (!%p1618_p5)
}
 0x4c6   :  { %1052 = dma.vmem_to_hbm [thread:$0]  %s1050_s27, 256, %s1813_s7, [#allocation4]  }
 0x4c7   :  { %1628 = dma.done.wait [#allocation4], 256  }
 0x4c8   :  { %1629 = vsyncadd [#allocation4], 4294967040 }
 0x4c9   :  { %1630 = dma.done.wait [#allocation12], 128  }
 0x4ca   :  { %1631 = vsyncadd [#allocation12], 4294967168 }
 0x4cb   :  { %1069 = vsyncpa [#allocation3], 1 }
 0x4cc   :  { %1070 = vsyncpa [#allocation6], 1 }
 0x4cd   :  { %1071 = vsyncpa [#allocation9], 1 }
 0x4ce   :  { %1072 = vsyncpa [#allocation4], 1 }
 0x4cf   :  { %1073 = vsyncpa [#allocation12], 1 }

</bundles_post_ra>
